<compile_context>
chip_gen: v7x
topology: tpu7x:2x2x1
jax: 0.10.0
libtpu: 0.0.40
codegen_flags: <defaults>
</compile_context>

<pallas_src>
import math

import jax
import jax.numpy as jnp
from jax.experimental import pallas as pl
from jax.experimental.pallas import tpu as pltpu

N_IN = 13          # true input features
N_IN_PAD = 16      # input features padded to a tidy sublane multiple
N_HID = 96         # true hidden width
N_OUT = 2          # true number of classes
PAD = 128          # padded hidden width (lane dimension)
TB_MAX = 1024      # max batch-tile rows (review: step overhead bound below ~512)
SPLIT_MIN = 1024   # force >=2 grid steps above this many rows (v7x megacore)


def _round_up(n, m):
    return ((n + m - 1) // m) * m


def _cdiv(a, b):
    return -(-a // b)


def _mlp_kernel(x_ref, w1_ref, wh_ref, b_ref, out_ref):
    """One (tb, 16) batch tile: full 6-layer MLP + log_softmax, all in VMEM.

    x_ref : (tb, 16)      bf16   (true 13 features, lanes 13..15 zero)
    w1_ref: (16, 128)     bf16   (rows 13..15 and cols 96..127 zero)
    wh_ref: (5, 128, 128) bf16   layers 2..6, padded rows/cols zero
    b_ref : (6, 1, 128)   f32    padded lanes zero
    out   : (tb, 2)       f32    log-probs of the 2 real classes
    """
    # Layer 1: (tb,16) x (16,128) bf16 MXU matmul, f32 accumulate.
    z = jnp.dot(x_ref[...], w1_ref[...], preferred_element_type=jnp.float32)
    h = jnp.maximum(z + b_ref[0], 0.0)                               # (tb, 128) f32

    # Layers 2..5: ReLU(h @ W + b).  Padded lanes stay exactly 0.
    for j in range(4):
        z = jnp.dot(h.astype(jnp.bfloat16), wh_ref[j],
                    preferred_element_type=jnp.float32)
        h = jnp.maximum(z + b_ref[j + 1], 0.0)

    # Layer 6 (no ReLU).
    z = jnp.dot(h.astype(jnp.bfloat16), wh_ref[4],
                preferred_element_type=jnp.float32) + b_ref[5]       # (tb, 128) f32

    # log_softmax over the first N_OUT lanes; padded lanes masked to -inf so
    # exp() contributes exactly 0 there.
    lane = jax.lax.broadcasted_iota(jnp.int32, z.shape, dimension=1)
    z_masked = jnp.where(lane < N_OUT, z, -jnp.inf)
    m = jnp.max(z_masked, axis=-1, keepdims=True)                    # (tb, 1)
    s = jnp.sum(jnp.exp(z_masked - m), axis=-1, keepdims=True)       # (tb, 1)

    # Compact store: only the 2 real class columns go back to HBM.
    out_ref[...] = z[:, :N_OUT] - (m + jnp.log(s))                   # (tb, 2)


@jax.jit
def wine_net_forward(x, params):
    """x: (batch, 13) float32.  params: dict of padded bf16 weights / f32 biases."""
    batch = x.shape[0]
    bpad8 = _round_up(batch, 8)

    # Balanced batch tiling: tb as large as possible (<= TB_MAX), <8 padding
    # rows per step, and >=2 steps for big batches so v7x's 2 TCs both work.
    n_steps = _cdiv(bpad8, TB_MAX)
    if n_steps == 1 and bpad8 >= SPLIT_MIN:
        n_steps = 2
    tb = _round_up(_cdiv(bpad8, n_steps), 8)
    bpad = tb * n_steps

    # Narrow bf16 input (32 B/row in HBM instead of a 512 B/row f32 slab).
    x_pad = jnp.zeros((bpad, N_IN_PAD), jnp.bfloat16).at[:batch, :N_IN].set(
        x.astype(jnp.bfloat16))

    out = pl.pallas_call(
        _mlp_kernel,
        out_shape=jax.ShapeDtypeStruct((bpad, N_OUT), jnp.float32),
        grid_spec=pltpu.PrefetchScalarGridSpec(
            num_scalar_prefetch=0,
            grid=(n_steps,),
            in_specs=[
                pl.BlockSpec((tb, N_IN_PAD), lambda i: (i, 0)),       # x tile
                pl.BlockSpec((N_IN_PAD, PAD), lambda i: (0, 0)),      # w1 (resident)
                pl.BlockSpec((5, PAD, PAD), lambda i: (0, 0, 0)),     # w2..w6 (resident)
                pl.BlockSpec((6, 1, PAD), lambda i: (0, 0, 0)),       # biases (resident)
            ],
            out_specs=pl.BlockSpec((tb, N_OUT), lambda i: (i, 0)),    # compact (tb, 2)
        ),
        compiler_params=pltpu.CompilerParams(
            dimension_semantics=("parallel",),        # shard batch across v7x's 2 TCs
            vmem_limit_bytes=32 * 1024 * 1024,        # insurance for v5e's 16 MiB default
        ),
    )(x_pad, params["w1"], params["w_hid"], params["b"])
    return out[:batch]                                               # (batch, 2)


def init_params(key):
    """Deterministic init mimicking PyTorch nn.Linear defaults:
    weight, bias ~ U(-1/sqrt(fan_in), 1/sqrt(fan_in)).
    Stored padded + pre-transposed:
      w1    : (16, 128)     bf16
      w_hid : (5, 128, 128) bf16  (layers 2..6)
      b     : (6, 1, 128)   f32
    """
    dims = [(N_IN, N_HID)] + [(N_HID, N_HID)] * 4 + [(N_HID, N_OUT)]
    ws, bs = [], []
    for fan_in, fan_out in dims:
        key, kw, kb = jax.random.split(key, 3)
        bound = 1.0 / math.sqrt(fan_in)
        ws.append(jax.random.uniform(kw, (fan_in, fan_out), jnp.float32, -bound, bound))
        bs.append(jax.random.uniform(kb, (fan_out,), jnp.float32, -bound, bound))

    w1 = jnp.zeros((N_IN_PAD, PAD), jnp.float32).at[:N_IN, :N_HID].set(ws[0])
    w_hid = jnp.zeros((5, PAD, PAD), jnp.float32)
    for j in range(4):
        w_hid = w_hid.at[j, :N_HID, :N_HID].set(ws[j + 1])
    w_hid = w_hid.at[4, :N_HID, :N_OUT].set(ws[5])

    b = jnp.zeros((6, 1, PAD), jnp.float32)
    out_widths = [N_HID] * 5 + [N_OUT]
    for j in range(6):
        b = b.at[j, 0, :out_widths[j]].set(bs[j])

    return {"w1": w1.astype(jnp.bfloat16),
            "w_hid": w_hid.astype(jnp.bfloat16),
            "b": b}


def reference_forward(x, params):
    """Pure-JAX reference with the same bf16-weight / f32-accumulate arithmetic."""
    batch = x.shape[0]
    h = jnp.zeros((batch, N_IN_PAD), jnp.bfloat16).at[:, :N_IN].set(
        x.astype(jnp.bfloat16))
    z = jnp.dot(h, params["w1"], preferred_element_type=jnp.float32)
    h = jnp.maximum(z + params["b"][0], 0.0)
    for j in range(4):
        z = jnp.dot(h.astype(jnp.bfloat16), params["w_hid"][j],
                    preferred_element_type=jnp.float32)
        h = jnp.maximum(z + params["b"][j + 1], 0.0)
    z = jnp.dot(h.astype(jnp.bfloat16), params["w_hid"][4],
                preferred_element_type=jnp.float32) + params["b"][5]
    return jax.nn.log_softmax(z[:, :N_OUT], axis=-1)


if __name__ == "__main__":
    key = jax.random.PRNGKey(0)
    key, kx = jax.random.split(key)

    batch = 8
    x = jax.random.normal(kx, (batch, N_IN), jnp.float32)

    params = init_params(key)

    out = jax.block_until_ready(wine_net_forward(x, params))
    ref = reference_forward(x, params)

    assert out.shape == (batch, N_OUT), out.shape
    assert bool(jnp.all(jnp.isfinite(out)))
    max_err = float(jnp.max(jnp.abs(out - ref)))
    assert max_err < 2e-3, ("mismatch vs reference", max_err)

    print("KERNEL_OK")
</pallas_src>

<mosaic_0001>
module attributes {stable_mosaic.version = 11 : i64} {
  func.func @_mlp_kernel(%arg0: i32, %arg1: memref<8x16xbf16, #tpu.memory_space<vmem>>, %arg2: memref<16x128xbf16, #tpu.memory_space<vmem>>, %arg3: memref<5x128x128xbf16, #tpu.memory_space<vmem>>, %arg4: memref<6x1x128xf32, #tpu.memory_space<vmem>>, %arg5: memref<8x2xf32, #tpu.memory_space<vmem>>) attributes {dimension_semantics = [#tpu.dimension_semantics<parallel>], iteration_bounds = array<i64: 1>, scalar_prefetch = 0 : i64, scratch_operands = 0 : i64, tpu.core_type = #tpu.core_type<tc>, window_params = [{transform_indices = @transform_0, window_bounds = array<i64: 8, 16>}, {pipeline_mode = #tpu.pipeline_mode<synchronous>, transform_indices = @transform_1, window_bounds = array<i64: 16, 128>}, {pipeline_mode = #tpu.pipeline_mode<synchronous>, transform_indices = @transform_2, window_bounds = array<i64: 5, 128, 128>}, {pipeline_mode = #tpu.pipeline_mode<synchronous>, transform_indices = @transform_3, window_bounds = array<i64: 6, 1, 128>}, {transform_indices = @transform_4, window_bounds = array<i64: 8, 2>}]} {
    %c0 = arith.constant 0 : index
    %c0_0 = arith.constant 0 : index
    %0 = vector.load %arg1[%c0, %c0_0] : memref<8x16xbf16, #tpu.memory_space<vmem>>, vector<8x16xbf16>
    %c0_1 = arith.constant 0 : index
    %c0_2 = arith.constant 0 : index
    %1 = vector.load %arg2[%c0_1, %c0_2] : memref<16x128xbf16, #tpu.memory_space<vmem>>, vector<16x128xbf16>
    %cst = arith.constant dense<0.000000e+00> : vector<8x128xf32>
    %2 = tpu.matmul %0, %1, %cst {dimension_numbers = #tpu.dot_dimension_numbers<[1], [0], [0], [1], [0, 0, 1, 1], [], []>} : vector<8x16xbf16>, vector<16x128xbf16>, vector<8x128xf32> -> vector<8x128xf32>
    %c0_3 = arith.constant 0 : index
    %c0_4 = arith.constant 0 : index
    %c0_5 = arith.constant 0 : index
    %3 = vector.load %arg4[%c0_3, %c0_4, %c0_5] : memref<6x1x128xf32, #tpu.memory_space<vmem>>, vector<1x1x128xf32>
    %4 = vector.shape_cast %3 : vector<1x1x128xf32> to vector<1x128xf32>
    %5 = vector.broadcast %4 : vector<1x128xf32> to vector<8x128xf32>
    %6 = arith.addf %2, %5 : vector<8x128xf32>
    %cst_6 = arith.constant 0.000000e+00 : f32
    %7 = vector.broadcast %cst_6 : f32 to vector<8x128xf32>
    %8 = arith.maximumf %6, %7 : vector<8x128xf32>
    %9 = arith.truncf %8 : vector<8x128xf32> to vector<8x128xbf16>
    %c0_7 = arith.constant 0 : index
    %c0_8 = arith.constant 0 : index
    %c0_9 = arith.constant 0 : index
    %10 = vector.load %arg3[%c0_7, %c0_8, %c0_9] : memref<5x128x128xbf16, #tpu.memory_space<vmem>>, vector<1x128x128xbf16>
    %11 = vector.shape_cast %10 : vector<1x128x128xbf16> to vector<128x128xbf16>
    %cst_10 = arith.constant dense<0.000000e+00> : vector<8x128xf32>
    %12 = tpu.matmul %9, %11, %cst_10 {dimension_numbers = #tpu.dot_dimension_numbers<[1], [0], [0], [1], [0, 0, 1, 1], [], []>} : vector<8x128xbf16>, vector<128x128xbf16>, vector<8x128xf32> -> vector<8x128xf32>
    %c1 = arith.constant 1 : index
    %c0_11 = arith.constant 0 : index
    %c0_12 = arith.constant 0 : index
    %13 = vector.load %arg4[%c1, %c0_11, %c0_12] : memref<6x1x128xf32, #tpu.memory_space<vmem>>, vector<1x1x128xf32>
    %14 = vector.shape_cast %13 : vector<1x1x128xf32> to vector<1x128xf32>
    %15 = vector.broadcast %14 : vector<1x128xf32> to vector<8x128xf32>
    %16 = arith.addf %12, %15 : vector<8x128xf32>
    %cst_13 = arith.constant 0.000000e+00 : f32
    %17 = vector.broadcast %cst_13 : f32 to vector<8x128xf32>
    %18 = arith.maximumf %16, %17 : vector<8x128xf32>
    %19 = arith.truncf %18 : vector<8x128xf32> to vector<8x128xbf16>
    %c1_14 = arith.constant 1 : index
    %c0_15 = arith.constant 0 : index
    %c0_16 = arith.constant 0 : index
    %20 = vector.load %arg3[%c1_14, %c0_15, %c0_16] : memref<5x128x128xbf16, #tpu.memory_space<vmem>>, vector<1x128x128xbf16>
    %21 = vector.shape_cast %20 : vector<1x128x128xbf16> to vector<128x128xbf16>
    %cst_17 = arith.constant dense<0.000000e+00> : vector<8x128xf32>
    %22 = tpu.matmul %19, %21, %cst_17 {dimension_numbers = #tpu.dot_dimension_numbers<[1], [0], [0], [1], [0, 0, 1, 1], [], []>} : vector<8x128xbf16>, vector<128x128xbf16>, vector<8x128xf32> -> vector<8x128xf32>
    %c2 = arith.constant 2 : index
    %c0_18 = arith.constant 0 : index
    %c0_19 = arith.constant 0 : index
    %23 = vector.load %arg4[%c2, %c0_18, %c0_19] : memref<6x1x128xf32, #tpu.memory_space<vmem>>, vector<1x1x128xf32>
    %24 = vector.shape_cast %23 : vector<1x1x128xf32> to vector<1x128xf32>
    %25 = vector.broadcast %24 : vector<1x128xf32> to vector<8x128xf32>
    %26 = arith.addf %22, %25 : vector<8x128xf32>
    %cst_20 = arith.constant 0.000000e+00 : f32
    %27 = vector.broadcast %cst_20 : f32 to vector<8x128xf32>
    %28 = arith.maximumf %26, %27 : vector<8x128xf32>
    %29 = arith.truncf %28 : vector<8x128xf32> to vector<8x128xbf16>
    %c2_21 = arith.constant 2 : index
    %c0_22 = arith.constant 0 : index
    %c0_23 = arith.constant 0 : index
    %30 = vector.load %arg3[%c2_21, %c0_22, %c0_23] : memref<5x128x128xbf16, #tpu.memory_space<vmem>>, vector<1x128x128xbf16>
    %31 = vector.shape_cast %30 : vector<1x128x128xbf16> to vector<128x128xbf16>
    %cst_24 = arith.constant dense<0.000000e+00> : vector<8x128xf32>
    %32 = tpu.matmul %29, %31, %cst_24 {dimension_numbers = #tpu.dot_dimension_numbers<[1], [0], [0], [1], [0, 0, 1, 1], [], []>} : vector<8x128xbf16>, vector<128x128xbf16>, vector<8x128xf32> -> vector<8x128xf32>
    %c3 = arith.constant 3 : index
    %c0_25 = arith.constant 0 : index
    %c0_26 = arith.constant 0 : index
    %33 = vector.load %arg4[%c3, %c0_25, %c0_26] : memref<6x1x128xf32, #tpu.memory_space<vmem>>, vector<1x1x128xf32>
    %34 = vector.shape_cast %33 : vector<1x1x128xf32> to vector<1x128xf32>
    %35 = vector.broadcast %34 : vector<1x128xf32> to vector<8x128xf32>
    %36 = arith.addf %32, %35 : vector<8x128xf32>
    %cst_27 = arith.constant 0.000000e+00 : f32
    %37 = vector.broadcast %cst_27 : f32 to vector<8x128xf32>
    %38 = arith.maximumf %36, %37 : vector<8x128xf32>
    %39 = arith.truncf %38 : vector<8x128xf32> to vector<8x128xbf16>
    %c3_28 = arith.constant 3 : index
    %c0_29 = arith.constant 0 : index
    %c0_30 = arith.constant 0 : index
    %40 = vector.load %arg3[%c3_28, %c0_29, %c0_30] : memref<5x128x128xbf16, #tpu.memory_space<vmem>>, vector<1x128x128xbf16>
    %41 = vector.shape_cast %40 : vector<1x128x128xbf16> to vector<128x128xbf16>
    %cst_31 = arith.constant dense<0.000000e+00> : vector<8x128xf32>
    %42 = tpu.matmul %39, %41, %cst_31 {dimension_numbers = #tpu.dot_dimension_numbers<[1], [0], [0], [1], [0, 0, 1, 1], [], []>} : vector<8x128xbf16>, vector<128x128xbf16>, vector<8x128xf32> -> vector<8x128xf32>
    %c4 = arith.constant 4 : index
    %c0_32 = arith.constant 0 : index
    %c0_33 = arith.constant 0 : index
    %43 = vector.load %arg4[%c4, %c0_32, %c0_33] : memref<6x1x128xf32, #tpu.memory_space<vmem>>, vector<1x1x128xf32>
    %44 = vector.shape_cast %43 : vector<1x1x128xf32> to vector<1x128xf32>
    %45 = vector.broadcast %44 : vector<1x128xf32> to vector<8x128xf32>
    %46 = arith.addf %42, %45 : vector<8x128xf32>
    %cst_34 = arith.constant 0.000000e+00 : f32
    %47 = vector.broadcast %cst_34 : f32 to vector<8x128xf32>
    %48 = arith.maximumf %46, %47 : vector<8x128xf32>
    %49 = arith.truncf %48 : vector<8x128xf32> to vector<8x128xbf16>
    %c4_35 = arith.constant 4 : index
    %c0_36 = arith.constant 0 : index
    %c0_37 = arith.constant 0 : index
    %50 = vector.load %arg3[%c4_35, %c0_36, %c0_37] : memref<5x128x128xbf16, #tpu.memory_space<vmem>>, vector<1x128x128xbf16>
    %51 = vector.shape_cast %50 : vector<1x128x128xbf16> to vector<128x128xbf16>
    %cst_38 = arith.constant dense<0.000000e+00> : vector<8x128xf32>
    %52 = tpu.matmul %49, %51, %cst_38 {dimension_numbers = #tpu.dot_dimension_numbers<[1], [0], [0], [1], [0, 0, 1, 1], [], []>} : vector<8x128xbf16>, vector<128x128xbf16>, vector<8x128xf32> -> vector<8x128xf32>
    %c5 = arith.constant 5 : index
    %c0_39 = arith.constant 0 : index
    %c0_40 = arith.constant 0 : index
    %53 = vector.load %arg4[%c5, %c0_39, %c0_40] : memref<6x1x128xf32, #tpu.memory_space<vmem>>, vector<1x1x128xf32>
    %54 = vector.shape_cast %53 : vector<1x1x128xf32> to vector<1x128xf32>
    %55 = vector.broadcast %54 : vector<1x128xf32> to vector<8x128xf32>
    %56 = arith.addf %52, %55 : vector<8x128xf32>
    %57 = tpu.iota {dimensions = array<i32: 1>} : vector<8x128xi32>
    %c2_i32 = arith.constant 2 : i32
    %58 = vector.broadcast %c2_i32 : i32 to vector<8x128xi32>
    %59 = arith.cmpi slt, %57, %58 : vector<8x128xi32>
    %cst_41 = arith.constant 0xFF800000 : f32
    %60 = vector.broadcast %cst_41 : f32 to vector<8x128xf32>
    %61 = arith.select %59, %56, %60 : vector<8x128xi1>, vector<8x128xf32>
    %cst_42 = arith.constant dense<0xFF800000> : vector<8xf32>
    %62 = vector.multi_reduction <maximumf>, %61, %cst_42 [1] : vector<8x128xf32> to vector<8xf32>
    %63 = vector.shape_cast %62 : vector<8xf32> to vector<8x1xf32>
    %64 = vector.broadcast %63 : vector<8x1xf32> to vector<8x128xf32>
    %65 = arith.subf %61, %64 : vector<8x128xf32>
    %66 = math.exp %65 : vector<8x128xf32>
    %cst_43 = arith.constant dense<0.000000e+00> : vector<8xf32>
    %67 = vector.multi_reduction <add>, %66, %cst_43 [1] : vector<8x128xf32> to vector<8xf32>
    %68 = vector.shape_cast %67 : vector<8xf32> to vector<8x1xf32>
    %69 = vector.extract_strided_slice %56 {offsets = [0, 0], sizes = [8, 2], strides = [1, 1]} : vector<8x128xf32> to vector<8x2xf32>
    %70 = math.log %68 : vector<8x1xf32>
    %71 = arith.addf %63, %70 : vector<8x1xf32>
    %72 = vector.broadcast %71 : vector<8x1xf32> to vector<8x2xf32>
    %73 = arith.subf %69, %72 : vector<8x2xf32>
    %c0_44 = arith.constant 0 : index
    %c0_45 = arith.constant 0 : index
    %74 = vector.load %arg5[%c0_44, %c0_45] : memref<8x2xf32, #tpu.memory_space<vmem>>, vector<8x2xf32>
    tpu.vector_store %arg5[%c0_44, %c0_45], %73 {strides = array<i32>} : memref<8x2xf32, #tpu.memory_space<vmem>>, vector<8x2xf32>,
    return
  }
  func.func @transform_0(%arg0: i32) -> (i32, i32) {
    %c0_i32 = arith.constant 0 : i32
    %c0_i32_0 = arith.constant 0 : i32
    return %arg0, %c0_i32 : i32, i32
  }
  func.func @transform_1(%arg0: i32) -> (i32, i32) {
    %c0_i32 = arith.constant 0 : i32
    %c0_i32_0 = arith.constant 0 : i32
    %c0_i32_1 = arith.constant 0 : i32
    return %c0_i32, %c0_i32_0 : i32, i32
  }
  func.func @transform_2(%arg0: i32) -> (i32, i32, i32) {
    %c0_i32 = arith.constant 0 : i32
    %c0_i32_0 = arith.constant 0 : i32
    %c0_i32_1 = arith.constant 0 : i32
    %c0_i32_2 = arith.constant 0 : i32
    return %c0_i32, %c0_i32_0, %c0_i32_1 : i32, i32, i32
  }
  func.func @transform_3(%arg0: i32) -> (i32, i32, i32) {
    %c0_i32 = arith.constant 0 : i32
    %c0_i32_0 = arith.constant 0 : i32
    %c0_i32_1 = arith.constant 0 : i32
    %c0_i32_2 = arith.constant 0 : i32
    return %c0_i32, %c0_i32_0, %c0_i32_1 : i32, i32, i32
  }
  func.func @transform_4(%arg0: i32) -> (i32, i32) {
    %c0_i32 = arith.constant 0 : i32
    %c0_i32_0 = arith.constant 0 : i32
    return %arg0, %c0_i32 : i32, i32
  }
}

</mosaic_0001>

<bundles_post_ra>
// kernel: wine_net_forward.1
= control target key start
LH: loop header
LB: loop body
LE: loop exit
PB: predicated region body
PF: predicated region fallthrough
CT: control target
= control target key end

     0   :  { %9 = vsyncpa [#allocation3], 0  ;;  %s968_s15 = smov [#allocation2]   ;;  %s1090_s0 = inlined_call_operand.vmem [shape: bf16[8,16], index: 0, kind: input, shape index: {}]   ;;  %s1091_s1 = inlined_call_operand.vmem [shape: bf16[16,128], index: 1, kind: input, shape index: {}]   ;;  %s1092_s2 = inlined_call_operand.hbm [shape: bf16[5,128,128], index: 2, kind: input, shape index: {}]   ;;  %s1093_s3 = inlined_call_operand.vmem [shape: f32[6,1,128], index: 3, kind: input, shape index: {}]   ;;  %s1094_s4 = inlined_call_operand.vmem [shape: f32[8,2], index: 4, kind: output, shape index: {}]  }
   0x1   :  { %s19_s16 = sshll.u32 %s968_s15, 4  ;;  %s944_s19 = scalar_lea.hbm %s1092_s2, 5120  ;;  %s20_s16 = int_to_ptr.vmem [resolvable:$true] %s19_s16 }
   0x2   :  { %p945_p0 = scmp.ne.s32.totalorder %s1092_s2, %s944_s19  ;;  %p948_p1 = scmp.lt.u32.totalorder %s944_s19, %s1092_s2 }
   0x4   :  { %p950_p2 = pnand %p948_p1, %p945_p0 }
   0x6   :  { %953 = shalt.err (!%p950_p2)
}
   0x7   :  { %s954_s24 = scalar_lea.vmem %s20_s16, 5120  ;;  %p959_p4 = scmp.lt.s32.totalorder %s20_s16, %s20_s16 }
   0x8   :  { %p955_p3 = scmp.ne.s32.totalorder %s20_s16, %s954_s24  ;;  %p960_p5 = scmp.lt.s32.totalorder %s954_s24, %s954_s24 }
   0xa   :  { %p961_p6 = por %p960_p5, %p959_p4 }
   0xc   :  { %p962_p7 = pnand %p961_p6, %p955_p3 }
   0xe   :  { %965 = shalt.err (!%p962_p7)
}
   0xf   :  { %s969_s25 = smov 64   ;;  %s970_s26 = smov 4  }
  0x10   :  { %25 = dma.hbm_to_vmem [thread:$0]  %s1092_s2, 5120, %s20_s16, [#allocation3], %s969_s25, %s969_s25, %s970_s26  }
  0x11   :  { %966 = dma.done.wait [#allocation3], 5120  }
  0x12   :  { %967 = vsyncadd [#allocation3], 4294962176  ;;  %v971_v0 = vmov 0.0   ;;  %vm972_vm0 = vmmov 0   ;;  %v899_v1 = vld [vmem:[%s1091_s1] sm:$0xff]   ;;  %vm48_vm1 = vcmask 130048  }
  0x13   :  { %788 = vmatprep.subr.bf16.mxu0 %v971_v0  ;;  %790 = vmatprep.mubr.msk.bf16.mxu0 %vm972_vm0, %v971_v0  ;;  %v32_v2 = vld [vmem:[%s1090_s0] sm:$0xf]  ;;  %v901_v4 = vld [vmem:[#allocation2 + $0x8] sm:$0xff]   ;;  %v902_v5 = vld [vmem:[#allocation2 + $0x10] sm:$0xff]   ;;  %vm681_vm3 = vcmask 15360  }
  0x14   :  { %794 = vmatprep.subr.bf16.mxu1 %v971_v0  ;;  %810 = vmatprep.mubr.msk.bf16.mxu1 %vm972_vm0, %v971_v0  ;;  %v900_v3 = vld [vmem:[#allocation2] sm:$0xff]   ;;  %v903_v6 = vld [vmem:[#allocation2 + $0x18] sm:$0xff]   ;;  %v905_v8 = vld [vmem:[#allocation2 + $0x28] sm:$0xff]  }
  0x15   :  { %789 = vmatpush3.bf16.msra.mxu0 %v899_v1  ;;  %795 = vmatpush3.bf16.msra.mxu1 %v900_v3  ;;  %v904_v7 = vld [vmem:[#allocation2 + $0x20] sm:$0xff]   ;;  %v906_v9 = vld [vmem:[#allocation2 + $0x30] sm:$0xff]   ;;  %v907_v10 = vld [vmem:[#allocation2 + $0x38] sm:$0xff]  }
  0x16   :  { %814 = vmatprep.subr.bf16.mxu0 %v971_v0  ;;  %796 = vmatprep.subr.bf16.mxu1 %v971_v0  ;;  %v908_v11 = vld [vmem:[#allocation2 + $0x40] sm:$0xff]   ;;  %v909_v12 = vld [vmem:[#allocation2 + $0x48] sm:$0xff]   ;;  %v910_v13 = vld [vmem:[#allocation2 + $0x50] sm:$0xff]  }
  0x17   :  { %v911_v14 = vld [vmem:[#allocation2 + $0x58] sm:$0xff]   ;;  %v912_v15 = vld [vmem:[#allocation2 + $0x60] sm:$0xff]   ;;  %v913_v16 = vld [vmem:[#allocation2 + $0x68] sm:$0xff]  }
  0x18   :  { %791 = vmatmul.mubr.msk.bf16.vlgmr.msra.gmra.mrb[0].mxu0 %vm48_vm1, %v32_v2  ;;  %v688_v17 = vld [vmem:[%s1093_s3] ss:$0 sm:$0xff]  ;;  %v914_v25 = vld [vmem:[#allocation2 + $0x70] sm:$0xff]   ;;  %v915_v26 = vld [vmem:[#allocation2 + $0x78] sm:$0xff]  }
  0x19   :  { %830 = vmatprep.mubr.msk.bf16.mxu0 %vm972_vm0, %v971_v0  ;;  %797 = vmatpush3.bf16.msra.mxu1 %v901_v4  ;;  %v916_v27 = vld [vmem:[#allocation2 + $0x80] sm:$0xff]   ;;  %v917_v28 = vld [vmem:[#allocation2 + $0x88] sm:$0xff]   ;;  %v918_v29 = vld [vmem:[#allocation2 + $0x90] sm:$0xff]  }
  0x1a   :  { %798 = vmatprep.subr.bf16.mxu1 %v971_v0  ;;  %815 = vmatpush3.bf16.msra.mxu0 %v908_v11  ;;  %v919_v30 = vld [vmem:[#allocation2 + $0x98] sm:$0xff]   ;;  %v920_v31 = vld [vmem:[#allocation2 + $0xa0] sm:$0xff]   ;;  %v921_v32 = vld [vmem:[#allocation2 + $0xa8] sm:$0xff]  }
  0x1b   :  { %816 = vmatprep.subr.bf16.mxu0 %v971_v0  ;;  %v692_v33 = vld [vmem:[%s1093_s3 + $0x1] ss:$0 sm:$0xff]  ;;  %v922_v41 = vld [vmem:[#allocation2 + $0xb0] sm:$0xff]   ;;  %v923_v42 = vld [vmem:[#allocation2 + $0xb8] sm:$0xff]  }
  0x1c   :  { %v924_v43 = vld [vmem:[#allocation2 + $0xc0] sm:$0xff]   ;;  %v925_v44 = vld [vmem:[#allocation2 + $0xc8] sm:$0xff]   ;;  %v926_v45 = vld [vmem:[#allocation2 + $0xd0] sm:$0xff]  }
  0x1d   :  { %799 = vmatpush3.bf16.msra.mxu1 %v902_v5  ;;  %v927_v46 = vld [vmem:[#allocation2 + $0xd8] sm:$0xff]   ;;  %v928_v47 = vld [vmem:[#allocation2 + $0xe0] sm:$0xff]   ;;  %v929_v48 = vld [vmem:[#allocation2 + $0xe8] sm:$0xff]  }
  0x1e   :  { %800 = vmatprep.subr.bf16.mxu1 %v971_v0  ;;  %817 = vmatpush3.bf16.msra.mxu0 %v909_v12  ;;  %v702_v49 = vld [vmem:[%s1093_s3 + $0x2] ss:$0 sm:$0xff]  ;;  %v930_v57 = vld [vmem:[#allocation2 + $0xf0] sm:$0xff]   ;;  %v931_v58 = vld [vmem:[#allocation2 + $0xf8] sm:$0xff]  }
  0x1f   :  { %818 = vmatprep.subr.bf16.mxu0 %v971_v0  ;;  %v932_v59 = vld [vmem:[#allocation2 + $0x100] sm:$0xff]   ;;  %v933_v60 = vld [vmem:[#allocation2 + $0x108] sm:$0xff]   ;;  %v934_v61 = vld [vmem:[#allocation2 + $0x110] sm:$0xff]  }
  0x20   :  { %v935_v62 = vld [vmem:[#allocation2 + $0x118] sm:$0xff]   ;;  %v936_v63 = vld [vmem:[#allocation2 + $0x120] sm:$0xff]   ;;  %v937_v1 = vld [vmem:[#allocation2 + $0x128] sm:$0xff]  }
  0x21   :  { %801 = vmatpush3.bf16.msra.mxu1 %v903_v6  ;;  %v712_v2 = vld [vmem:[%s1093_s3 + $0x3] ss:$0 sm:$0xff]  ;;  %v939_v11 = vld [vmem:[#allocation2 + $0x138] sm:$0xff]   ;;  %v722_v12 = vld [vmem:[%s1093_s3 + $0x4] ss:$0 sm:$0xff] }
  0x22   :  { %802 = vmatprep.subr.bf16.mxu1 %v971_v0  ;;  %819 = vmatpush3.bf16.msra.mxu0 %v910_v13 }
  0x23   :  { %820 = vmatprep.subr.bf16.mxu0 %v971_v0 }
  0x25   :  { %803 = vmatpush3.bf16.msra.mxu1 %v904_v7 }
  0x26   :  { %804 = vmatprep.subr.bf16.mxu1 %v971_v0  ;;  %821 = vmatpush3.bf16.msra.mxu0 %v911_v14 }
  0x27   :  { %822 = vmatprep.subr.bf16.mxu0 %v971_v0 }
  0x29   :  { %805 = vmatpush3.bf16.msra.mxu1 %v905_v8 }
  0x2a   :  { %806 = vmatprep.subr.bf16.mxu1 %v971_v0  ;;  %823 = vmatpush3.bf16.msra.mxu0 %v912_v15 }
  0x2b   :  { %824 = vmatprep.subr.bf16.mxu0 %v971_v0 }
  0x2d   :  { %807 = vmatpush3.bf16.msra.mxu1 %v906_v9 }
  0x2e   :  { %808 = vmatprep.subr.bf16.mxu1 %v971_v0  ;;  %825 = vmatpush3.bf16.msra.mxu0 %v913_v16 }
  0x2f   :  { %826 = vmatprep.subr.bf16.mxu0 %v971_v0 }
  0x31   :  { %809 = vmatpush3.bf16.msra.mxu1 %v907_v10  ;;  %v938_v10 = vld [vmem:[#allocation2 + $0x130] sm:$0xff]  }
  0x32   :  { %834 = vmatprep.subr.bf16.mxu1 %v971_v0  ;;  %827 = vmatpush3.bf16.msra.mxu0 %v914_v25 }
  0x33   :  { %828 = vmatprep.subr.bf16.mxu0 %v971_v0 }
  0x36   :  { %829 = vmatpush3.bf16.msra.mxu0 %v915_v26 }
  0x37   :  { %854 = vmatprep.subr.bf16.mxu0 %v971_v0 }
  0xeb   :  { %v86_v18 = vpop.f32.mrb[0].mxu0 }
  0xec   :  { %v87_v19 = vadd.f32 %v688_v17, %v86_v18  ;;  %v792_v20 = vpop.f32.mrb[1].mxu0 }
  0xed   :  { %v89_v21 = vpop.f32.mrb[2].mxu0  ;;  %v666_v20 = vlaneseq }
  0xee   :  { %v92_v22 = vmax.f32 %v87_v19, 0.0  ;;  %v793_v23 = vpop.f32.mrb[3].mxu0 }
  0xef   :  { %v667_v21 = vand.u32 127, %v666_v20 }
  0xf0   :  { %v93_v24 = vpack.c.bf16 %v92_v22, %v92_v22 }
  0xf1   :  { %vm668_vm2 = vcmp.lt.s32.totalorder %v667_v21, 2 }
  0xf2   :  { %811 = vmatmul.mubr.bf16.vlgmr.msra.gmra.mrb[0].mxu1 %v93_v24 }
  0xf3   :  { %850 = vmatprep.mubr.msk.bf16.mxu1 %vm972_vm0, %v971_v0  ;;  %835 = vmatpush3.bf16.msra.mxu1 %v916_v27 }
  0xf4   :  { %836 = vmatprep.subr.bf16.mxu1 %v971_v0 }
  0xf7   :  { %837 = vmatpush3.bf16.msra.mxu1 %v917_v28 }
  0xf8   :  { %838 = vmatprep.subr.bf16.mxu1 %v971_v0 }
  0xfb   :  { %839 = vmatpush3.bf16.msra.mxu1 %v918_v29 }
  0xfc   :  { %840 = vmatprep.subr.bf16.mxu1 %v971_v0 }
  0xff   :  { %841 = vmatpush3.bf16.msra.mxu1 %v919_v30 }
 0x100   :  { %842 = vmatprep.subr.bf16.mxu1 %v971_v0 }
 0x103   :  { %843 = vmatpush3.bf16.msra.mxu1 %v920_v31 }
 0x104   :  { %844 = vmatprep.subr.bf16.mxu1 %v971_v0 }
 0x107   :  { %845 = vmatpush3.bf16.msra.mxu1 %v921_v32 }
 0x108   :  { %846 = vmatprep.subr.bf16.mxu1 %v971_v0 }
 0x10b   :  { %847 = vmatpush3.bf16.msra.mxu1 %v922_v41 }
 0x10c   :  { %848 = vmatprep.subr.bf16.mxu1 %v971_v0 }
 0x10f   :  { %849 = vmatpush3.bf16.msra.mxu1 %v923_v42 }
 0x110   :  { %874 = vmatprep.subr.bf16.mxu1 %v971_v0 }
 0x1c5   :  { %v200_v34 = vpop.f32.mrb[0].mxu1 }
 0x1c6   :  { %v201_v35 = vadd.f32 %v692_v33, %v200_v34  ;;  %v812_v36 = vpop.f32.mrb[1].mxu1 }
 0x1c7   :  { %v203_v37 = vpop.f32.mrb[2].mxu1 }
 0x1c8   :  { %v206_v38 = vmax.f32 %v201_v35, 0.0  ;;  %v813_v39 = vpop.f32.mrb[3].mxu1 }
 0x1ca   :  { %v207_v40 = vpack.c.bf16 %v206_v38, %v206_v38 }
 0x1cc   :  { %831 = vmatmul.mubr.bf16.vlgmr.msra.gmra.mrb[4].mxu0 %v207_v40 }
 0x1cd   :  { %870 = vmatprep.mubr.msk.bf16.mxu0 %vm972_vm0, %v971_v0  ;;  %855 = vmatpush3.bf16.msra.mxu0 %v924_v43 }
 0x1ce   :  { %856 = vmatprep.subr.bf16.mxu0 %v971_v0 }
 0x1d1   :  { %857 = vmatpush3.bf16.msra.mxu0 %v925_v44 }
 0x1d2   :  { %858 = vmatprep.subr.bf16.mxu0 %v971_v0 }
 0x1d5   :  { %859 = vmatpush3.bf16.msra.mxu0 %v926_v45 }
 0x1d6   :  { %860 = vmatprep.subr.bf16.mxu0 %v971_v0 }
 0x1d9   :  { %861 = vmatpush3.bf16.msra.mxu0 %v927_v46 }
 0x1da   :  { %862 = vmatprep.subr.bf16.mxu0 %v971_v0 }
 0x1dd   :  { %863 = vmatpush3.bf16.msra.mxu0 %v928_v47 }
 0x1de   :  { %864 = vmatprep.subr.bf16.mxu0 %v971_v0 }
 0x1e1   :  { %865 = vmatpush3.bf16.msra.mxu0 %v929_v48 }
 0x1e2   :  { %866 = vmatprep.subr.bf16.mxu0 %v971_v0 }
 0x1e5   :  { %867 = vmatpush3.bf16.msra.mxu0 %v930_v57 }
 0x1e6   :  { %868 = vmatprep.subr.bf16.mxu0 %v971_v0 }
 0x1e9   :  { %869 = vmatpush3.bf16.msra.mxu0 %v931_v58 }
 0x29f   :  { %v315_v50 = vpop.f32.mrb[4].mxu0 }
 0x2a0   :  { %v316_v51 = vadd.f32 %v702_v49, %v315_v50  ;;  %v832_v52 = vpop.f32.mrb[5].mxu0 }
 0x2a1   :  { %v318_v53 = vpop.f32.mrb[6].mxu0 }
 0x2a2   :  { %v321_v54 = vmax.f32 %v316_v51, 0.0  ;;  %v833_v55 = vpop.f32.mrb[7].mxu0 }
 0x2a4   :  { %v322_v56 = vpack.c.bf16 %v321_v54, %v321_v54 }
 0x2a6   :  { %851 = vmatmul.mubr.bf16.vlgmr.msra.gmra.mrb[4].mxu1 %v322_v56 }
 0x2a7   :  { %890 = vmatprep.mubr.msk.bf16.mxu1 %vm972_vm0, %v971_v0  ;;  %875 = vmatpush3.bf16.msra.mxu1 %v932_v59 }
 0x2a8   :  { %876 = vmatprep.subr.bf16.mxu1 %v971_v0 }
 0x2ab   :  { %877 = vmatpush3.bf16.msra.mxu1 %v933_v60 }
 0x2ac   :  { %878 = vmatprep.subr.bf16.mxu1 %v971_v0 }
 0x2af   :  { %879 = vmatpush3.bf16.msra.mxu1 %v934_v61 }
 0x2b0   :  { %880 = vmatprep.subr.bf16.mxu1 %v971_v0 }
 0x2b3   :  { %881 = vmatpush3.bf16.msra.mxu1 %v935_v62 }
 0x2b4   :  { %882 = vmatprep.subr.bf16.mxu1 %v971_v0 }
 0x2b7   :  { %883 = vmatpush3.bf16.msra.mxu1 %v936_v63 }
 0x2b8   :  { %884 = vmatprep.subr.bf16.mxu1 %v971_v0 }
 0x2bb   :  { %885 = vmatpush3.bf16.msra.mxu1 %v937_v1 }
 0x2bc   :  { %886 = vmatprep.subr.bf16.mxu1 %v971_v0 }
 0x2bf   :  { %887 = vmatpush3.bf16.msra.mxu1 %v938_v10 }
 0x2c0   :  { %888 = vmatprep.subr.bf16.mxu1 %v971_v0  ;;  %v732_v0 = vld [vmem:[%s1093_s3 + $0x5] ss:$0 sm:$0xff] }
 0x2c3   :  { %889 = vmatpush3.bf16.msra.mxu1 %v939_v11 }
 0x379   :  { %v430_v3 = vpop.f32.mrb[4].mxu1 }
 0x37a   :  { %v431_v4 = vadd.f32 %v712_v2, %v430_v3  ;;  %v852_v5 = vpop.f32.mrb[5].mxu1 }
 0x37b   :  { %v433_v6 = vpop.f32.mrb[6].mxu1 }
 0x37c   :  { %v436_v7 = vmax.f32 %v431_v4, 0.0  ;;  %v853_v8 = vpop.f32.mrb[7].mxu1 }
 0x37e   :  { %v437_v9 = vpack.c.bf16 %v436_v7, %v436_v7 }
 0x380   :  { %871 = vmatmul.mubr.bf16.vlgmr.msra.gmra.mrb[8].mxu0 %v437_v9 }
 0x453   :  { %v545_v13 = vpop.f32.mrb[8].mxu0 }
 0x454   :  { %v546_v14 = vadd.f32 %v722_v12, %v545_v13  ;;  %v872_v15 = vpop.f32.mrb[9].mxu0 }
 0x455   :  { %v548_v16 = vpop.f32.mrb[10].mxu0 }
 0x456   :  { %v551_v17 = vmax.f32 %v546_v14, 0.0  ;;  %v873_v18 = vpop.f32.mrb[11].mxu0 }
 0x458   :  { %v552_v19 = vpack.c.bf16 %v551_v17, %v551_v17 }
 0x45a   :  { %891 = vmatmul.mubr.bf16.vlgmr.msra.gmra.mrb[8].mxu1 %v552_v19 }
 0x52d   :  { %v660_v22 = vpop.f32.mrb[8].mxu1 }
 0x52e   :  { %v661_v23 = vadd.f32 %v732_v0, %v660_v22  ;;  %v892_v24 = vpop.f32.mrb[9].mxu1 }
 0x52f   :  { %v663_v25 = vpop.f32.mrb[10].mxu1 }
 0x530   :  { %v893_v26 = vpop.f32.mrb[11].mxu1  ;;  %v669_v27 = vsel %vm668_vm2, %v661_v23, -inf }
 0x531   :  { %670 = vmax.xlane.f32.xlu0 %v669_v27 }
 0x5be   :  { %v671_v28 = vpop.xlane.xlu0 %670 }
 0x5bf   :  { %v672_v29 = vsub.f32 %v669_v27, %v671_v28 }
 0x5c1   :  { %v673_v30 = vmul.f32 1.442695, %v672_v29 }
 0x5c3   :  { %940 = vpow2.f32 %v673_v30 }
 0x5cd   :  { %v941_v31 = vpop.eup %940 }
 0x5ce   :  { %675 = vadd.xlane.f32.xlu0 %v941_v31 }
 0x65b   :  { %v676_v32 = vpop.xlane.xlu0 %675 }
 0x65c   :  { %942 = vlog2.f32 %v676_v32 }
 0x666   :  { %v943_v33 = vpop.eup %942 }
 0x667   :  { %v678_v34 = vmul.f32 0.6931472, %v943_v33 }
 0x669   :  { %v679_v35 = vadd.f32 %v678_v34, %v671_v28 }
 0x66b   :  { %v680_v36 = vsub.f32 %v661_v23, %v679_v35 }
 0x66d   :  { %682 = vst.msk [vmem:[%s1094_s4] sm:$0xff] %vm681_vm3, %v680_v36 }
 0x66e   :  { %687 = vsyncpa [#allocation3], 1 }

</bundles_post_ra>
